<compile_context>
chip_gen: v6e
topology: v6e:2x2x1
jax: 0.10.0
libtpu: 0.0.40
codegen_flags: <defaults>
</compile_context>

<pallas_src>
import jax
import jax.numpy as jnp
from jax.experimental import pallas as pl
from jax.experimental.pallas import tpu as pltpu

EPSILON = 1e-8

# Conservative per-block budget: ~2 MiB.  Live pipeline buffers are roughly
# 2 (double-buffer) x 2 (input + output) x block => ~8 MiB total, which fits
# the v5e 16 MiB scoped default and leaves ample headroom on v6e / v7x.
_BLOCK_BUDGET_BYTES = 2 * 1024 * 1024


def _pixel_norm_kernel(x_ref, o_ref):
    # x_ref, o_ref: (NB, C, THW) blocks in VMEM; channel axis is second-to-last.
    x = x_ref[...].astype(jnp.float32)
    mean_sq = jnp.mean(x * x, axis=-2, keepdims=True)      # sublane reduce over C
    inv = jax.lax.rsqrt(mean_sq + EPSILON)                  # EUP rsqrt (free slot)
    o_ref[...] = (x * inv).astype(o_ref.dtype)


def _choose_spatial_tile(HW, C, elem_bytes, budget):
    """Pick a lane tile THW (multiple of 128 when possible) within `budget`."""
    if HW <= 128:
        return HW  # full-dim block; may be < 128 lanes (handled by NB batching)
    max_lanes = max(128, (budget // (C * elem_bytes)) // 128 * 128)
    if HW % 128 == 0:
        # Largest multiple of 128 that divides HW exactly and fits the budget.
        best, t = 128, 128
        limit = min(HW, max_lanes)
        while t <= limit:
            if HW % t == 0:
                best = t
            t += 128
        return best
    # HW not lane-aligned (unusual for StyleGAN): take it whole if it fits,
    # otherwise tile with cdiv -- Pallas masks the partial last tile on store.
    if C * HW * elem_bytes <= budget:
        return HW
    return min(max_lanes, HW)


def pixel_norm(x):
    """x: (N, C, H, W) -> (N, C, H, W), normalized across the channel dim."""
    N, C, H, W = x.shape
    HW = H * W
    elem_bytes = jnp.dtype(x.dtype).itemsize
    x2d = x.reshape(N, C, HW)

    THW = _choose_spatial_tile(HW, C, elem_bytes, _BLOCK_BUDGET_BYTES)

    # Batch multiple samples per grid step only when the whole spatial extent
    # fits in one tile (small feature maps); otherwise one sample per step.
    NB = 1
    if THW == HW:
        per_sample = C * HW * elem_bytes
        for nb in range(1, N + 1):
            if N % nb == 0 and nb * per_sample <= _BLOCK_BUDGET_BYTES:
                NB = nb

    grid = (N // NB, pl.cdiv(HW, THW))
    block = (NB, C, THW)
    block_bytes = NB * C * THW * elem_bytes

    # Explicit scoped-VMEM limit: in+out double buffers plus headroom,
    # floored at 16 MiB, capped well under v7x's 64 MiB physical VMEM.
    vmem_limit = int(min(48 * 1024 * 1024,
                         max(16 * 1024 * 1024, 4 * block_bytes + (4 << 20))))

    total_elems = N * C * HW
    cost = pl.CostEstimate(
        flops=3 * total_elems,              # square, reduce-add, scale
        transcendentals=N * HW,             # one rsqrt per pixel
        bytes_accessed=2 * total_elems * elem_bytes,
    )

    out = pl.pallas_call(
        _pixel_norm_kernel,
        out_shape=jax.ShapeDtypeStruct((N, C, HW), x.dtype),
        grid_spec=pltpu.PrefetchScalarGridSpec(
            num_scalar_prefetch=0,
            grid=grid,
            in_specs=[pl.BlockSpec(block, lambda i, j: (i, 0, j))],
            out_specs=pl.BlockSpec(block, lambda i, j: (i, 0, j)),
        ),
        compiler_params=pltpu.CompilerParams(
            dimension_semantics=("parallel", "parallel"),
            vmem_limit_bytes=vmem_limit,
        ),
        cost_estimate=cost,
    )(x2d)

    return out.reshape(N, C, H, W)


if __name__ == "__main__":
    key = jax.random.PRNGKey(0)
    x = jax.random.normal(key, (2, 4, 16, 16), dtype=jnp.float32)

    y = pixel_norm(x)
    jax.block_until_ready(y)

    # reference check in plain JAX
    ref = x * jax.lax.rsqrt(jnp.mean(x * x, axis=1, keepdims=True) + EPSILON)
    assert y.shape == x.shape
    assert jnp.allclose(y, ref, atol=1e-5, rtol=1e-5)

    print("KERNEL_OK")
</pallas_src>

<mosaic_0001>
module attributes {stable_mosaic.version = 11 : i64} {
  func.func @_pixel_norm_kernel(%arg0: i32, %arg1: i32, %arg2: memref<2x4x256xf32, #tpu.memory_space<vmem>>, %arg3: memref<2x4x256xf32, #tpu.memory_space<vmem>>) attributes {dimension_semantics = [#tpu.dimension_semantics<parallel>, #tpu.dimension_semantics<parallel>], iteration_bounds = array<i64: 1, 1>, scalar_prefetch = 0 : i64, scratch_operands = 0 : i64, tpu.core_type = #tpu.core_type<tc>, window_params = [{transform_indices = @transform_0, window_bounds = array<i64: 2, 4, 256>}, {transform_indices = @transform_1, window_bounds = array<i64: 2, 4, 256>}]} {
    %c0 = arith.constant 0 : index
    %c0_0 = arith.constant 0 : index
    %c0_1 = arith.constant 0 : index
    %0 = vector.load %arg2[%c0, %c0_0, %c0_1] : memref<2x4x256xf32, #tpu.memory_space<vmem>>, vector<2x4x256xf32>
    %1 = arith.mulf %0, %0 : vector<2x4x256xf32>
    %cst = arith.constant dense<0.000000e+00> : vector<2x256xf32>
    %2 = vector.multi_reduction <add>, %1, %cst [1] : vector<2x4x256xf32> to vector<2x256xf32>
    %3 = vector.shape_cast %2 : vector<2x256xf32> to vector<2x1x256xf32>
    %cst_2 = arith.constant 4.000000e+00 : f32
    %4 = vector.broadcast %cst_2 : f32 to vector<2x1x256xf32>
    %5 = arith.divf %3, %4 : vector<2x1x256xf32>
    %cst_3 = arith.constant 9.99999993E-9 : f32
    %6 = vector.broadcast %cst_3 : f32 to vector<2x1x256xf32>
    %7 = arith.addf %5, %6 : vector<2x1x256xf32>
    %8 = math.rsqrt %7 : vector<2x1x256xf32>
    %9 = vector.broadcast %8 : vector<2x1x256xf32> to vector<2x4x256xf32>
    %10 = arith.mulf %0, %9 : vector<2x4x256xf32>
    %c0_4 = arith.constant 0 : index
    %c0_5 = arith.constant 0 : index
    %c0_6 = arith.constant 0 : index
    %11 = vector.load %arg3[%c0_4, %c0_5, %c0_6] : memref<2x4x256xf32, #tpu.memory_space<vmem>>, vector<2x4x256xf32>
    tpu.vector_store %arg3[%c0_4, %c0_5, %c0_6], %10 {strides = array<i32>} : memref<2x4x256xf32, #tpu.memory_space<vmem>>, vector<2x4x256xf32>,
    return
  }
  func.func @transform_0(%arg0: i32, %arg1: i32) -> (i32, i32, i32) {
    %c0_i32 = arith.constant 0 : i32
    %c0_i32_0 = arith.constant 0 : i32
    return %arg0, %c0_i32, %arg1 : i32, i32, i32
  }
  func.func @transform_1(%arg0: i32, %arg1: i32) -> (i32, i32, i32) {
    %c0_i32 = arith.constant 0 : i32
    %c0_i32_0 = arith.constant 0 : i32
    return %arg0, %c0_i32, %arg1 : i32, i32, i32
  }
}

</mosaic_0001>

<bundles_post_ra>
// kernel: tpu_custom_call.1
= control target key start
LH: loop header
LB: loop body
LE: loop exit
PB: predicated region body
PF: predicated region fallthrough
CT: control target
= control target key end

     0   :  { %6 = vsyncpa [#allocation3], 0  ;;  %s186_s0 = inlined_call_operand.hbm [shape: f32[2,4,256], index: 0, kind: input, shape index: {}]   ;;  %s187_s1 = inlined_call_operand.hbm [shape: f32[2,4,256], index: 1, kind: output, shape index: {}]  }
   0x1   :  { %7 = vsyncpa [#allocation4], 0  ;;  %s160_s6 = smov [#allocation2]  }
   0x2   :  { %s13_s7 = sshll.u32 %s160_s6, 4  ;;  %s14_s7 = int_to_ptr.vmem [resolvable:$true] %s13_s7 }
   0x3   :  { %s124_s8 = scalar_lea.vmem %s14_s7, 256  ;;  %p129_p1 = scmp.lt.s32.totalorder %s14_s7, %s14_s7 }
   0x4   :  { %p125_p0 = scmp.ne.s32.totalorder %s14_s7, %s124_s8  ;;  %p130_p2 = scmp.lt.s32.totalorder %s124_s8, %s124_s8 }
   0x6   :  { %p131_p3 = por %p130_p2, %p129_p1 }
   0x8   :  { %p132_p4 = pnand %p131_p3, %p125_p0 }
   0xa   :  { %135 = shalt.err (!%p132_p4)
}
   0xb   :  { %s161_s9 = smov 128   ;;  %s162_s10 = smov 8  }
   0xc   :  { %19 = dma.hbm_to_vmem [thread:$0]  %s186_s0, 256, %s14_s7, [#allocation3], %s161_s9, %s161_s9, %s162_s10  }
   0xd   :  { %156 = dma.done.wait [#allocation3], 256  }
   0xe   :  { %157 = vsyncadd [#allocation3], 4294967040  ;;  %v23_v0 = vld [vmem:[#allocation2] sm:$0xff]  ;;  %vm33_vm0 = vcmask 1043456   ;;  %v24_v1 = vld [vmem:[#allocation2 + $0x8] sm:$0xff]  ;;  %s163_s0 = smov [#allocation5]  }
   0xf   :  { %v25_v2 = vmul.f32 %v23_v0, %v23_v0  ;;  %v26_v3 = vmul.f32 %v24_v1, %v24_v1  ;;  %s92_s13 = sshll.u32 %s163_s0, 4  ;;  %s93_s13 = int_to_ptr.vmem [resolvable:$true] %s92_s13 }
  0x10   :  { %s136_s14 = scalar_lea.vmem %s93_s13, 256  ;;  %p141_p6 = scmp.lt.s32.totalorder %s93_s13, %s93_s13 }
  0x11   :  { %v29_v4 = vcombine.high %v25_v2, %v25_v2  ;;  %v34_v5 = vsel %vm33_vm0, %v25_v2, 0.0  ;;  %v30_v6 = vcombine.high %v26_v3, %v26_v3  ;;  %v48_v7 = vsel %vm33_vm0, %v26_v3, 0.0  ;;  %p137_p5 = scmp.ne.s32.totalorder %s93_s13, %s136_s14  ;;  %p142_p7 = scmp.lt.s32.totalorder %s136_s14, %s136_s14 }
  0x12   :  { %v35_v8 = vrot.slane %v34_v5, 4  ;;  %v49_v9 = vrot.slane %v48_v7, 4 }
  0x13   :  { %v41_v10 = vsel %vm33_vm0, %v29_v4, 0.0  ;;  %v55_v11 = vsel %vm33_vm0, %v30_v6, 0.0  ;;  %p143_p8 = por %p142_p7, %p141_p6 }
  0x14   :  { %v36_v12 = vadd.f32 %v35_v8, %v34_v5  ;;  %v42_v13 = vrot.slane %v41_v10, 4  ;;  %v50_v14 = vadd.f32 %v49_v9, %v48_v7  ;;  %v56_v15 = vrot.slane %v55_v11, 4 }
  0x15   :  { %p144_p9 = pnand %p143_p8, %p137_p5 }
  0x16   :  { %v37_v16 = vrot.slane %v36_v12, 2  ;;  %v43_v17 = vadd.f32 %v42_v13, %v41_v10  ;;  %v51_v18 = vrot.slane %v50_v14, 2  ;;  %v57_v19 = vadd.f32 %v56_v15, %v55_v11 }
  0x18   :  { %v38_v20 = vadd.f32 %v37_v16, %v36_v12  ;;  %v44_v21 = vrot.slane %v43_v17, 2  ;;  %v52_v22 = vadd.f32 %v51_v18, %v50_v14  ;;  %v58_v23 = vrot.slane %v57_v19, 2 }
  0x1a   :  { %v39_v24 = vrot.slane %v38_v20, 1  ;;  %v45_v25 = vadd.f32 %v44_v21, %v43_v17  ;;  %v53_v26 = vrot.slane %v52_v22, 1  ;;  %v59_v27 = vadd.f32 %v58_v23, %v57_v19 }
  0x1c   :  { %v40_v28 = vadd.f32 %v39_v24, %v38_v20  ;;  %v46_v29 = vrot.slane %v45_v25, 1  ;;  %v54_v30 = vadd.f32 %v53_v26, %v52_v22  ;;  %v60_v31 = vrot.slane %v59_v27, 1 }
  0x1e   :  { %v47_v32 = vadd.f32 %v46_v29, %v45_v25  ;;  %v63_v33 = vmul.f32 0.25, %v40_v28  ;;  %v61_v34 = vadd.f32 %v60_v31, %v59_v27  ;;  %v65_v35 = vmul.f32 0.25, %v54_v30 }
  0x20   :  { %v64_v36 = vmul.f32 0.25, %v47_v32  ;;  %v67_v37 = vadd.f32 1e-08, %v63_v33  ;;  %v66_v38 = vmul.f32 0.25, %v61_v34  ;;  %v69_v39 = vadd.f32 1e-08, %v65_v35 }
  0x22   :  { %v68_v40 = vadd.f32 1e-08, %v64_v36  ;;  %108 = vrsqrt.f32 %v67_v37  ;;  %v70_v41 = vadd.f32 1e-08, %v66_v38 }
  0x23   :  { %110 = vrsqrt.f32 %v69_v39 }
  0x24   :  { %112 = vrsqrt.f32 %v68_v40 }
  0x25   :  { %114 = vrsqrt.f32 %v70_v41 }
  0x2f   :  { %v109_v42 = vpop.eup %108 }
  0x30   :  { %v111_v43 = vpop.eup %110 }
  0x31   :  { %v113_v44 = vpop.eup %112 }
  0x32   :  { %v115_v45 = vpop.eup %114  ;;  %v79_v46 = vcombine.low %v109_v42, %v113_v44 }
  0x33   :  { %v80_v47 = vcombine.low %v111_v43, %v115_v45 }
  0x34   :  { %v83_v48 = vmul.f32 %v79_v46, %v23_v0 }
  0x35   :  { %v84_v49 = vmul.f32 %v80_v47, %v24_v1 }
  0x36   :  { %85 = vst [vmem:[#allocation5] sm:$0xff] %v83_v48 }
  0x37   :  { %86 = vst [vmem:[#allocation5 + $0x8] sm:$0xff] %v84_v49 }
  0x38   :  { %147 = shalt.err (!%p144_p9)
}
  0x39   :  { %98 = dma.vmem_to_hbm [thread:$0]  %s93_s13, 256, %s187_s1, [#allocation4], %s161_s9, %s161_s9, %s162_s10  }
  0x3a   :  { %158 = dma.done.wait [#allocation4], 256  }
  0x3b   :  { %159 = vsyncadd [#allocation4], 4294967040 }
  0x3c   :  { %102 = vsyncpa [#allocation3], 1 }
  0x3d   :  { %103 = vsyncpa [#allocation4], 1 }

</bundles_post_ra>
